<compile_context>
chip_gen: v7x
topology: tpu7x:2x2x1
jax: 0.10.0
libtpu: 0.0.40
codegen_flags: <defaults>
</compile_context>

<pallas_src>
import functools

import jax
import jax.numpy as jnp
from jax.experimental import pallas as pl
from jax.experimental.pallas import tpu as pltpu


def _round_up(x, m):
    return ((x + m - 1) // m) * m


# -----------------------------------------------------------------------------
# Kernels
# -----------------------------------------------------------------------------

def _linear_single_block_kernel(x_ref, w_ref, b_ref, o_ref):
    """Whole problem resident in VMEM: y = x @ W + b (no grid, no pipeline)."""
    o_ref[...] = (
        jnp.dot(x_ref[...], w_ref[...], preferred_element_type=jnp.float32)
        + b_ref[...]
    ).astype(o_ref.dtype)


def _linear_tile_kernel(x_ref, w_ref, b_ref, o_ref):
    """One (tm, tn) output tile; K is NOT split, so no accumulator scratch."""
    o_ref[...] = (
        jnp.dot(x_ref[...], w_ref[...], preferred_element_type=jnp.float32)
        + b_ref[...]
    ).astype(o_ref.dtype)


def _linear_tile_kernel_ksplit(x_ref, w_ref, b_ref, o_ref, acc_ref):
    """One (tm, tn) output tile accumulated over the K grid axis.

    The bias is folded into the mandatory k == 0 accumulator init, so the
    last-k epilogue is just a cast + store.
    """
    k = pl.program_id(2)

    @pl.when(k == 0)
    def _():
        acc_ref[...] = jnp.broadcast_to(
            b_ref[...].astype(jnp.float32), acc_ref.shape
        )

    acc_ref[...] += jnp.dot(
        x_ref[...], w_ref[...], preferred_element_type=jnp.float32
    )

    @pl.when(k == pl.num_programs(2) - 1)
    def _():
        o_ref[...] = acc_ref[...].astype(o_ref.dtype)


# -----------------------------------------------------------------------------
# Wrapper
# -----------------------------------------------------------------------------

@functools.partial(jax.jit, static_argnames=("tm", "tn", "tk"))
def identity_resampler_forward(x, weight_t, bias, *, tm=None, tn=None, tk=None):
    """y = x @ weight_t + bias  (i.e. nn.Linear forward with weight_t = W.T).

    x:        (..., in_dim)
    weight_t: (in_dim, out_dim)
    bias:     (out_dim,)
    returns:  (..., out_dim)
    """
    *lead, in_dim = x.shape
    out_dim = weight_t.shape[1]
    M = 1
    for d in lead:
        M *= d

    x2 = x.reshape(M, in_dim)
    out_dtype = x.dtype

    cost = pl.CostEstimate(
        flops=2 * M * in_dim * out_dim,
        transcendentals=0,
        bytes_accessed=(
            x2.size * x2.dtype.itemsize
            + weight_t.size * weight_t.dtype.itemsize
            + bias.size * bias.dtype.itemsize
            + M * out_dim * jnp.dtype(out_dtype).itemsize
        ),
    )

    # ---- tiny-problem fast path: single VMEM block, skip the grid entirely --
    small = (M <= 256 and in_dim <= 1024 and out_dim <= 1024
             and tm is None and tn is None and tk is None)
    if small:
        y2 = pl.pallas_call(
            _linear_single_block_kernel,
            out_shape=jax.ShapeDtypeStruct((M, out_dim), out_dtype),
            in_specs=[
                pl.BlockSpec(memory_space=pltpu.MemorySpace.VMEM),
                pl.BlockSpec(memory_space=pltpu.MemorySpace.VMEM),
                pl.BlockSpec(memory_space=pltpu.MemorySpace.VMEM),
            ],
            out_specs=pl.BlockSpec(memory_space=pltpu.MemorySpace.VMEM),
            cost_estimate=cost,
        )(x2, weight_t, bias.reshape(1, out_dim))
        return y2.reshape(*lead, out_dim)

    # ---- tiled path ----------------------------------------------------------
    # MXU-friendly, lane-dense tiles.  128/256 multiples keep the systolic array
    # fed full-width on v5e/v6e/v7x and make the output stores unmasked.
    if tm is None:
        tm = 256
    if tn is None:
        tn = 256
    if tk is None:
        k128 = _round_up(in_dim, 128)
        tk = k128 if k128 <= 1024 else 512  # keep K un-split when it fits
    tm = min(tm, _round_up(M, 8))
    tn = min(tn, _round_up(out_dim, 128))
    tk = min(tk, _round_up(in_dim, 128))

    Mp = _round_up(M, tm)
    Np = _round_up(out_dim, tn)
    Kp = _round_up(in_dim, tk)

    # Zero-pad ragged edges (zeros contribute nothing to the matmul); the
    # result is sliced back to (M, out_dim) afterwards.  This fixes the
    # floor-division tail-drop bug from the previous version.
    if (Mp, Kp) != (M, in_dim):
        x2 = jnp.pad(x2, ((0, Mp - M), (0, Kp - in_dim)))
    w2 = weight_t
    if (Kp, Np) != (in_dim, out_dim):
        w2 = jnp.pad(weight_t, ((0, Kp - in_dim), (0, Np - out_dim)))
    b2 = bias if Np == out_dim else jnp.pad(bias, (0, Np - out_dim))
    b2 = b2.reshape(1, Np)

    gm, gn, gk = Mp // tm, Np // tn, Kp // tk

    if gk == 1:
        # K not split: no accumulator scratch, no init/epilogue phases.
        y2p = pl.pallas_call(
            _linear_tile_kernel,
            out_shape=jax.ShapeDtypeStruct((Mp, Np), out_dtype),
            grid=(gm, gn),
            in_specs=[
                pl.BlockSpec((tm, Kp), lambda i, j: (i, 0)),   # x tile
                pl.BlockSpec((Kp, tn), lambda i, j: (0, j)),   # W tile
                pl.BlockSpec((1, tn), lambda i, j: (0, j)),    # bias tile
            ],
            out_specs=pl.BlockSpec((tm, tn), lambda i, j: (i, j)),
            compiler_params=pltpu.CompilerParams(
                dimension_semantics=("parallel", "parallel")
            ),
            cost_estimate=cost,
        )(x2, w2, b2)
    else:
        # K split: f32 accumulator, bias folded into the k==0 init.
        y2p = pl.pallas_call(
            _linear_tile_kernel_ksplit,
            out_shape=jax.ShapeDtypeStruct((Mp, Np), out_dtype),
            grid=(gm, gn, gk),
            in_specs=[
                pl.BlockSpec((tm, tk), lambda i, j, k: (i, k)),   # x tile
                pl.BlockSpec((tk, tn), lambda i, j, k: (k, j)),   # W tile
                pl.BlockSpec((1, tn), lambda i, j, k: (0, j)),    # bias tile
            ],
            out_specs=pl.BlockSpec((tm, tn), lambda i, j, k: (i, j)),
            scratch_shapes=[pltpu.VMEM((tm, tn), jnp.float32)],
            compiler_params=pltpu.CompilerParams(
                dimension_semantics=("parallel", "parallel", "arbitrary")
            ),
            cost_estimate=cost,
        )(x2, w2, b2)

    y2 = y2p[:M, :out_dim]
    return y2.reshape(*lead, out_dim)


# -----------------------------------------------------------------------------
# Demo / correctness checks
# -----------------------------------------------------------------------------

def _reference(x, weight_t, bias):
    return jnp.matmul(x, weight_t, precision=jax.lax.Precision.HIGHEST) + bias


def _make_case(key, batch, seq, in_dim, out_dim):
    kx, kw, kb = jax.random.split(key, 3)
    x = jax.random.normal(kx, (batch, seq, in_dim), dtype=jnp.float32)
    # PyTorch Linear weight shape is (out_dim, in_dim); we pass its transpose.
    w = jax.random.normal(kw, (out_dim, in_dim), dtype=jnp.float32) * (
        1.0 / jnp.sqrt(in_dim)
    )
    b = jax.random.normal(kb, (out_dim,), dtype=jnp.float32) * 0.01
    return x, w.T, b


if __name__ == "__main__":
    key = jax.random.PRNGKey(0)
    k1, k2, k3 = jax.random.split(key, 3)

    # 1) Tiny shapes from the module's typical use -> single-block fast path.
    x, wt, b = _make_case(k1, batch=2, seq=8, in_dim=32, out_dim=64)
    y = jax.block_until_ready(identity_resampler_forward(x, wt, b))
    assert y.shape == (2, 8, 64)
    assert jnp.allclose(y, _reference(x, wt, b), atol=1e-4, rtol=1e-4)

    # 2) Ragged (non-128-multiple) dims -> tiled path with padding, K un-split.
    x, wt, b = _make_case(k2, batch=4, seq=80, in_dim=96, out_dim=200)
    y = jax.block_until_ready(identity_resampler_forward(x, wt, b))
    assert y.shape == (4, 80, 200)
    assert jnp.allclose(y, _reference(x, wt, b), atol=1e-3, rtol=1e-3)

    # 3) Large K -> tiled path with K split + bias folded into accumulator init.
    x, wt, b = _make_case(k3, batch=2, seq=160, in_dim=1536, out_dim=256)
    y = jax.block_until_ready(identity_resampler_forward(x, wt, b))
    assert y.shape == (2, 160, 256)
    assert jnp.allclose(y, _reference(x, wt, b), atol=1e-3, rtol=1e-3)

    print("KERNEL_OK")
</pallas_src>

<mosaic_0001>
module attributes {stable_mosaic.version = 11 : i64} {
  func.func @_linear_single_block_kernel(%arg0: memref<16x32xf32, #tpu.memory_space<vmem>>, %arg1: memref<32x64xf32, #tpu.memory_space<vmem>>, %arg2: memref<1x64xf32, #tpu.memory_space<vmem>>, %arg3: memref<16x64xf32, #tpu.memory_space<vmem>>) attributes {dimension_semantics = [], scalar_prefetch = 0 : i64, scratch_operands = 0 : i64, tpu.core_type = #tpu.core_type<tc>} {
    %c0 = arith.constant 0 : index
    %c0_0 = arith.constant 0 : index
    %0 = vector.load %arg0[%c0, %c0_0] : memref<16x32xf32, #tpu.memory_space<vmem>>, vector<16x32xf32>
    %c0_1 = arith.constant 0 : index
    %c0_2 = arith.constant 0 : index
    %1 = vector.load %arg1[%c0_1, %c0_2] : memref<32x64xf32, #tpu.memory_space<vmem>>, vector<32x64xf32>
    %cst = arith.constant dense<0.000000e+00> : vector<16x64xf32>
    %2 = tpu.matmul %0, %1, %cst {dimension_numbers = #tpu.dot_dimension_numbers<[1], [0], [0], [1], [0, 0, 1, 1], [], []>} : vector<16x32xf32>, vector<32x64xf32>, vector<16x64xf32> -> vector<16x64xf32>
    %c0_3 = arith.constant 0 : index
    %c0_4 = arith.constant 0 : index
    %3 = vector.load %arg2[%c0_3, %c0_4] : memref<1x64xf32, #tpu.memory_space<vmem>>, vector<1x64xf32>
    %4 = vector.broadcast %3 : vector<1x64xf32> to vector<16x64xf32>
    %5 = arith.addf %2, %4 : vector<16x64xf32>
    %c0_5 = arith.constant 0 : index
    %c0_6 = arith.constant 0 : index
    %6 = vector.load %arg3[%c0_5, %c0_6] : memref<16x64xf32, #tpu.memory_space<vmem>>, vector<16x64xf32>
    tpu.vector_store %arg3[%c0_5, %c0_6], %5 {strides = array<i32>} : memref<16x64xf32, #tpu.memory_space<vmem>>, vector<16x64xf32>,
    return
  }
}

</mosaic_0001>

<bundles_post_ra>
// kernel: identity_resampler_forward.1
= control target key start
LH: loop header
LB: loop body
LE: loop exit
PB: predicated region body
PF: predicated region fallthrough
CT: control target
= control target key end

     0   :  { %8 = vsyncpa [#allocation3], 0  ;;  %s337_s0 = inlined_call_operand.hbm [shape: f32[16,32], index: 0, kind: input, shape index: {}]   ;;  %s338_s1 = inlined_call_operand.hbm [shape: f32[32,64], index: 1, kind: input, shape index: {}]   ;;  %s339_s2 = inlined_call_operand.vmem [shape: f32[1,64], index: 2, kind: input, shape index: {}]   ;;  %s340_s3 = inlined_call_operand.hbm [shape: f32[16,64], index: 3, kind: output, shape index: {}]  }
   0x1   :  { %9 = vsyncpa [#allocation6], 0 }
   0x2   :  { %10 = vsyncpa [#allocation4], 0  ;;  %s264_s12 = smov [#allocation2]   ;;  %s192_s16 = scalar_lea.hbm %s337_s0, 256 }
   0x3   :  { %s16_s13 = sshll.u32 %s264_s12, 4  ;;  %p193_p0 = scmp.ne.s32.totalorder %s337_s0, %s192_s16  ;;  %s17_s13 = int_to_ptr.vmem [resolvable:$true] %s16_s13 }
   0x4   :  { %p196_p1 = scmp.lt.u32.totalorder %s192_s16, %s337_s0 }
   0x6   :  { %p198_p2 = pnand %p196_p1, %p193_p0 }
   0x8   :  { %201 = shalt.err (!%p198_p2)
}
   0x9   :  { %s202_s21 = scalar_lea.vmem %s17_s13, 256  ;;  %p207_p4 = scmp.lt.s32.totalorder %s17_s13, %s17_s13 }
   0xa   :  { %p203_p3 = scmp.ne.s32.totalorder %s17_s13, %s202_s21  ;;  %p208_p5 = scmp.lt.s32.totalorder %s202_s21, %s202_s21 }
   0xc   :  { %p209_p6 = por %p208_p5, %p207_p4 }
   0xe   :  { %p210_p7 = pnand %p209_p6, %p203_p3 }
  0x10   :  { %213 = shalt.err (!%p210_p7)
}
  0x11   :  { %s265_s22 = smov 128   ;;  %s266_s23 = smov 8  }
  0x12   :  { %22 = dma.hbm_to_vmem [thread:$0]  %s337_s0, 256, %s17_s13, [#allocation3], %s265_s22, %s265_s22, %s266_s23  }
  0x13   :  { %s267_s26 = smov [#allocation5]   ;;  %s214_s30 = scalar_lea.hbm %s338_s1, 512 }
  0x14   :  { %s28_s27 = sshll.u32 %s267_s26, 4  ;;  %p215_p8 = scmp.ne.s32.totalorder %s338_s1, %s214_s30  ;;  %s29_s27 = int_to_ptr.vmem [resolvable:$true] %s28_s27 }
  0x15   :  { %p218_p9 = scmp.lt.u32.totalorder %s214_s30, %s338_s1 }
  0x17   :  { %p220_p10 = pnand %p218_p9, %p215_p8 }
  0x19   :  { %223 = shalt.err (!%p220_p10)
}
  0x1a   :  { %s224_s8 = scalar_lea.vmem %s29_s27, 512  ;;  %p229_p12 = scmp.lt.s32.totalorder %s29_s27, %s29_s27 }
  0x1b   :  { %p225_p11 = scmp.ne.s32.totalorder %s29_s27, %s224_s8  ;;  %p230_p13 = scmp.lt.s32.totalorder %s224_s8, %s224_s8 }
  0x1d   :  { %p231_p0 = por %p230_p13, %p229_p12 }
  0x1f   :  { %p232_p1 = pnand %p231_p0, %p225_p11 }
  0x21   :  { %235 = shalt.err (!%p232_p1)
}
  0x22   :  { %34 = dma.hbm_to_vmem [thread:$0]  %s338_s1, 512, %s29_s27, [#allocation6], %s265_s22, %s265_s22, %s266_s23  }
  0x23   :  { %258 = dma.done.wait [#allocation3], 256  }
  0x24   :  { %259 = vsyncadd [#allocation3], 4294967040 }
  0x25   :  { %260 = dma.done.wait [#allocation6], 512  }
  0x26   :  { %261 = vsyncadd [#allocation6], 4294966784  ;;  %vm56_vm0 = vcmask 261120   ;;  %v45_v0 = vld [vmem:[#allocation5] sm:$0xff]  ;;  %v46_v1 = vld [vmem:[#allocation5 + $0x8] sm:$0xff]  ;;  %s268_s11 = smov [#allocation7]  }
  0x27   :  { %v47_v2 = vld [vmem:[#allocation5 + $0x10] sm:$0xff]  ;;  %v179_v3 = vpack.c.bf16 %v46_v1, %v45_v0  ;;  %v48_v4 = vld [vmem:[#allocation5 + $0x18] sm:$0xff]  ;;  %s146_s12 = sshll.u32 %s268_s11, 4  ;;  %vm138_vm1 = vcmask 523264   ;;  %s147_s12 = int_to_ptr.vmem [resolvable:$true] %s146_s12 }
  0x28   :  { %v43_v5 = vld [vmem:[#allocation2] sm:$0xff]  ;;  %v183_v6 = vpack.c.bf16 %v48_v4, %v47_v2  ;;  %v44_v7 = vld [vmem:[#allocation2 + $0x8] sm:$0xff]  ;;  %s236_s13 = scalar_lea.vmem %s147_s12, 256  ;;  %p241_p3 = scmp.lt.s32.totalorder %s147_s12, %s147_s12 }
  0x29   :  { %176 = vmatprep.mubr.msk.f32.mxu0 %vm56_vm0, %v43_v5  ;;  %180 = vmatprep.subr.bf16.mxu0 %v179_v3  ;;  %v159_v8 = vld [vmem:[%s339_s2] ss:$0 sm:$0xff]  ;;  %p237_p2 = scmp.ne.s32.totalorder %s147_s12, %s236_s13  ;;  %p242_p4 = scmp.lt.s32.totalorder %s236_s13, %s236_s13 }
  0x2a   :  { %182 = vmatpush3.bf16.msra.mxu0 %v179_v3 }
  0x2b   :  { %184 = vmatprep.subr.bf16.mxu0 %v183_v6  ;;  %p243_p5 = por %p242_p4, %p241_p3 }
  0x2d   :  { %p244_p6 = pnand %p243_p5, %p237_p2 }
  0x2e   :  { %186 = vmatpush3.bf16.msra.mxu0 %v183_v6 }
  0x31   :  { %177 = vmatmul.mubr.msk.f32.vlgmr.msra.gmra.mrb[0].mxu0 %vm56_vm0, %v44_v7 }
 0x104   :  { %v178_v9 = vpop.f32.mrb[0].mxu0 }
 0x105   :  { %v135_v10 = vadd.f32 %v178_v9, %v159_v8  ;;  %v129_v11 = vpop.f32.mrb[1].mxu0 }
 0x106   :  { %v130_v12 = vadd.f32 %v159_v8, %v129_v11 }
 0x107   :  { %140 = vst.msk [vmem:[#allocation7 + $0x8] sm:$0xff] %vm138_vm1, %v135_v10 }
 0x108   :  { %139 = vst.msk [vmem:[#allocation7] sm:$0xff] %vm138_vm1, %v130_v12 }
 0x109   :  { %247 = shalt.err (!%p244_p6)
}
 0x10a   :  { %s248_s2 = scalar_lea.hbm %s340_s3, 256 }
 0x10b   :  { %p249_p7 = scmp.ne.s32.totalorder %s340_s3, %s248_s2  ;;  %p252_p8 = scmp.lt.u32.totalorder %s248_s2, %s340_s3 }
 0x10d   :  { %p254_p9 = pnand %p252_p8, %p249_p7 }
 0x10f   :  { %257 = shalt.err (!%p254_p9)
}
 0x110   :  { %152 = dma.vmem_to_hbm [thread:$0]  %s147_s12, 256, %s340_s3, [#allocation4], %s265_s22, %s265_s22, %s266_s23  }
 0x111   :  { %262 = dma.done.wait [#allocation4], 256  }
 0x112   :  { %263 = vsyncadd [#allocation4], 4294967040 }
 0x113   :  { %156 = vsyncpa [#allocation3], 1 }
 0x114   :  { %157 = vsyncpa [#allocation6], 1 }
 0x115   :  { %158 = vsyncpa [#allocation4], 1 }

</bundles_post_ra>
